<compile_context>
chip_gen: v5e
topology: v5e:2x2
jax: 0.10.0
libtpu: 0.0.40
codegen_flags: <defaults>
</compile_context>

<pallas_src>
import jax
import jax.numpy as jnp
from jax.experimental import pallas as pl
from jax.experimental.pallas import tpu as pltpu


def _build_pe_table(d_model: int, max_len: int, dtype=jnp.float32) -> jnp.ndarray:
    """Deterministic sinusoidal PE buffer, identical to the PyTorch __init__."""
    position = jnp.arange(0, max_len, dtype=jnp.float32)[:, None]          # (max_len, 1)
    div_term = jnp.exp(
        jnp.arange(0, d_model, 2, dtype=jnp.float32)
        * (-jnp.log(jnp.float32(10000.0)) / d_model)
    )                                                                       # (ceil(d/2),)
    ang = position * div_term                                               # (max_len, ceil(d/2))
    pe = jnp.zeros((max_len, d_model), dtype=jnp.float32)
    pe = pe.at[:, 0::2].set(jnp.sin(ang))
    pe = pe.at[:, 1::2].set(jnp.cos(ang[:, : d_model // 2]))                # handles odd d_model too
    return pe.astype(dtype)


def _pe_add_kernel(x_ref, pe_ref, o_ref):
    # x_ref/o_ref: (Bt, tr, cols) slab; pe_ref: (tr, cols) shared tile.
    o_ref[...] = (x_ref[...] + pe_ref[...][None, :, :]).astype(o_ref.dtype)


_MIN_SUBLANE = {4: 8, 2: 16, 1: 32}   # sublane packing per itemsize (f32 / bf16 / i8)


def _vmem_capacity_bytes() -> int:
    """Physical VMEM per core; conservative (v7x) fallback if the query fails."""
    try:
        info = pltpu.get_tpu_info()
        cap = getattr(info, "vmem_capacity_bytes", None)
        if cap:
            return int(cap)
    except Exception:
        pass
    return 64 * 1024 * 1024


def _largest_divisor_leq(n: int, cap: int) -> int:
    cap = max(1, min(n, cap))
    for d in range(cap, 0, -1):
        if n % d == 0:
            return d
    return 1


def _choose_tiles(B: int, rows: int, cols: int, itemsize: int, budget: int):
    """Pick (batch_tile, row_tile) so one x block is <= `budget` bytes.

    Prefers divisor tiles; if no clean row divisor exists, returns a
    budget-respecting tile and the caller uses a pl.cdiv grid (masked last block).
    """
    min_sub = _MIN_SUBLANE.get(itemsize, 8)
    row_bytes = max(1, cols * itemsize)

    # Batch tile: biggest divisor of B whose minimal row-slab still fits the budget.
    row_unit = min(rows, min_sub)
    bt_cap = max(1, budget // max(1, row_unit * row_bytes))
    bt = _largest_divisor_leq(B, bt_cap)

    # Row tile for that batch tile.
    max_rows = max(1, budget // max(1, bt * row_bytes))
    if rows <= max_rows:
        return bt, rows                               # full extent is always legal
    t = max(min_sub, (max_rows // min_sub) * min_sub)
    tt = t
    while tt >= min_sub:
        if rows % tt == 0:
            return bt, tt                             # clean divisor within budget
        tt -= min_sub
    return bt, t                                      # no divisor: cdiv grid, masked tail


def positional_encoding_forward(x: jnp.ndarray, pe: jnp.ndarray,
                                *, donate_x: bool = False,
                                force_pallas: bool = False) -> jnp.ndarray:
    """x: (B, S, D); pe: (max_len, D). Returns x + pe[:S] (broadcast over batch)."""
    B, S, D = x.shape
    itemsize = jnp.dtype(x.dtype).itemsize
    pe_slice = pe[:S, :].astype(x.dtype)    # pre-cast: halves PE read traffic for bf16 x

    # Tiny-shape fast path: kernel launch + DMA setup dwarfs a <1 MiB copy.
    if not force_pallas and B * S * D * itemsize < (1 << 20):
        return x + pe_slice[None, :, :]

    # Lane-dense 2D view of the per-batch (S, D) plane.
    pad = 0
    if D % 128 == 0:
        rows, cols = S, D
        x2, pe2 = x, pe_slice
    elif (S * D) % 128 == 0:
        rows, cols = (S * D) // 128, 128
        x2 = x.reshape(B, rows, cols)
        pe2 = pe_slice.reshape(rows, cols)
    else:
        # Pad feature dim to a multiple of 128 (avoids masked partial stores), slice after.
        pad = (-D) % 128
        rows, cols = S, D + pad
        x2 = jnp.pad(x, ((0, 0), (0, 0), (0, pad)))
        pe2 = jnp.pad(pe_slice, ((0, 0), (0, pad)))

    # Generation-aware VMEM plan: 6 live buffers (2x x, 2x out, 2x pe<=x) -> budget/8 per x block.
    vmem_limit = min(int(0.75 * _vmem_capacity_bytes()), 100 * 1024 * 1024)
    vmem_limit = max(vmem_limit, 32 * 1024 * 1024)
    x_block_budget = max(256 * 1024, vmem_limit // 8)
    bt, tr = _choose_tiles(B, rows, cols, itemsize, x_block_budget)

    # Seq tiles outermost, batch innermost: the shared PE block index is constant
    # over the inner axis, so each PE tile is fetched once per seq tile.
    grid = (pl.cdiv(rows, tr), B // bt)

    out = pl.pallas_call(
        _pe_add_kernel,
        out_shape=jax.ShapeDtypeStruct((B, rows, cols), x.dtype),
        grid_spec=pltpu.PrefetchScalarGridSpec(
            num_scalar_prefetch=0,
            grid=grid,
            in_specs=[
                pl.BlockSpec((bt, tr, cols), lambda s, b: (b, s, 0)),   # x slab
                pl.BlockSpec((tr, cols), lambda s, b: (s, 0)),          # shared PE tile
            ],
            out_specs=pl.BlockSpec((bt, tr, cols), lambda s, b: (b, s, 0)),
        ),
        compiler_params=pltpu.CompilerParams(
            dimension_semantics=("parallel", "parallel"),   # no reduction; v7x can split TCs
            vmem_limit_bytes=vmem_limit,
        ),
        cost_estimate=pl.CostEstimate(
            flops=B * rows * cols,
            transcendentals=0,
            bytes_accessed=(2 * B * rows * cols + rows * cols) * itemsize,
        ),
        input_output_aliases=({0: 0} if donate_x else {}),  # opt-in in-place add on x
    )(x2, pe2)

    if pad:
        return out[:, :, :D]
    return out.reshape(B, S, D)


if __name__ == "__main__":
    # Small shapes consistent with the module: d_model=256, batch=2, seq=16.
    d_model = 256
    max_len = 64
    batch = 2
    seq = 16

    key = jax.random.PRNGKey(0)
    x = jax.random.normal(key, (batch, seq, d_model), dtype=jnp.float32)
    pe = _build_pe_table(d_model, max_len, dtype=x.dtype)

    ref = x + pe[:seq, :][None, :, :]

    # Exercise the Pallas path explicitly (these shapes are below the fast-path cutoff).
    out = positional_encoding_forward(x, pe, force_pallas=True)
    out = jax.block_until_ready(out)
    assert out.shape == (batch, seq, d_model)
    assert jnp.allclose(out, ref, atol=1e-6, rtol=1e-6), "pallas path mismatch vs reference"

    # Tiny-shape fast path sanity check.
    out_fast = jax.block_until_ready(positional_encoding_forward(x, pe))
    assert jnp.allclose(out_fast, ref, atol=1e-6, rtol=1e-6), "fast path mismatch vs reference"

    print("KERNEL_OK")
</pallas_src>

<mosaic_0001>
module attributes {stable_mosaic.version = 11 : i64} {
  func.func @_pe_add_kernel(%arg0: i32, %arg1: i32, %arg2: memref<2x16x256xf32, #tpu.memory_space<vmem>>, %arg3: memref<16x256xf32, #tpu.memory_space<vmem>>, %arg4: memref<2x16x256xf32, #tpu.memory_space<vmem>>) attributes {dimension_semantics = [#tpu.dimension_semantics<parallel>, #tpu.dimension_semantics<parallel>], iteration_bounds = array<i64: 1, 1>, scalar_prefetch = 0 : i64, scratch_operands = 0 : i64, tpu.core_type = #tpu.core_type<tc>, window_params = [{transform_indices = @transform_0, window_bounds = array<i64: 2, 16, 256>}, {transform_indices = @transform_1, window_bounds = array<i64: 16, 256>}, {transform_indices = @transform_2, window_bounds = array<i64: 2, 16, 256>}]} {
    %c0 = arith.constant 0 : index
    %c0_0 = arith.constant 0 : index
    %c0_1 = arith.constant 0 : index
    %0 = vector.load %arg2[%c0, %c0_0, %c0_1] : memref<2x16x256xf32, #tpu.memory_space<vmem>>, vector<2x16x256xf32>
    %c0_2 = arith.constant 0 : index
    %c0_3 = arith.constant 0 : index
    %1 = vector.load %arg3[%c0_2, %c0_3] : memref<16x256xf32, #tpu.memory_space<vmem>>, vector<16x256xf32>
    %2 = vector.shape_cast %1 : vector<16x256xf32> to vector<1x16x256xf32>
    %3 = vector.broadcast %2 : vector<1x16x256xf32> to vector<2x16x256xf32>
    %4 = arith.addf %0, %3 : vector<2x16x256xf32>
    %c0_4 = arith.constant 0 : index
    %c0_5 = arith.constant 0 : index
    %c0_6 = arith.constant 0 : index
    %5 = vector.load %arg4[%c0_4, %c0_5, %c0_6] : memref<2x16x256xf32, #tpu.memory_space<vmem>>, vector<2x16x256xf32>
    tpu.vector_store %arg4[%c0_4, %c0_5, %c0_6], %4 {strides = array<i32>} : memref<2x16x256xf32, #tpu.memory_space<vmem>>, vector<2x16x256xf32>,
    return
  }
  func.func @transform_0(%arg0: i32, %arg1: i32) -> (i32, i32, i32) {
    %c0_i32 = arith.constant 0 : i32
    %c0_i32_0 = arith.constant 0 : i32
    return %arg1, %arg0, %c0_i32 : i32, i32, i32
  }
  func.func @transform_1(%arg0: i32, %arg1: i32) -> (i32, i32) {
    %c0_i32 = arith.constant 0 : i32
    %c0_i32_0 = arith.constant 0 : i32
    return %arg0, %c0_i32 : i32, i32
  }
  func.func @transform_2(%arg0: i32, %arg1: i32) -> (i32, i32, i32) {
    %c0_i32 = arith.constant 0 : i32
    %c0_i32_0 = arith.constant 0 : i32
    return %arg1, %arg0, %c0_i32 : i32, i32, i32
  }
}

</mosaic_0001>

<bundles_post_ra>
// kernel: tpu_custom_call.1
= control target key start
LH: loop header
LB: loop body
LE: loop exit
PB: predicated region body
PF: predicated region fallthrough
CT: control target
= control target key end

     0   :  { %7 = vsyncpa [#allocation3], 0  ;;  %s213_s0 = inlined_call_operand.hbm [shape: f32[2,16,256], index: 0, kind: input, shape index: {}]   ;;  %s214_s1 = inlined_call_operand.hbm [shape: f32[16,256], index: 1, kind: input, shape index: {}]   ;;  %s215_s2 = inlined_call_operand.hbm [shape: f32[2,16,256], index: 2, kind: output, shape index: {}]  }
   0x1   :  { %8 = vsyncpa [#allocation6], 0 }
   0x2   :  { %9 = vsyncpa [#allocation4], 0  ;;  %s14_s11 = sshll.u32 %s213_s0, 4  ;;  %s175_s12 = smov [#allocation2]   ;;  %s15_s11 = int_to_ptr.hbm [resolvable:$true] %s14_s11 }
   0x3   :  { %s16_s13 = sshll.u32 %s175_s12, 4  ;;  %s27_s16 = sshll.u32 %s214_s1, 4  ;;  %s17_s13 = int_to_ptr.vmem [resolvable:$true] %s16_s13  ;;  %s28_s16 = int_to_ptr.hbm [resolvable:$true] %s27_s16 }
   0x4   :  { %s176_s17 = smov 256   ;;  %s177_s18 = smov 16  }
   0x5   :  { %22 = dma.hbm_to_vmem [thread:$0]  %s15_s11, 1024, %s17_s13, [#allocation3], %s176_s17, %s176_s17, %s177_s18  }
   0x6   :  { %s178_s19 = smov [#allocation5]  }
   0x7   :  { %s29_s20 = sshll.u32 %s178_s19, 4  ;;  %s30_s20 = int_to_ptr.vmem [resolvable:$true] %s29_s20 }
   0x8   :  { %35 = dma.hbm_to_vmem [thread:$0]  %s28_s16, 512, %s30_s20, [#allocation6], %s176_s17, %s176_s17, %s177_s18  }
   0x9   :  { %169 = dma.done.wait [#allocation3], 1024  }
   0xa   :  { %170 = vsyncadd [#allocation3], 4294966272 }
   0xb   :  { %171 = dma.done.wait [#allocation6], 512  }
   0xc   :  { %172 = vsyncadd [#allocation6], 4294966784  ;;  %v44_v0 = vld [vmem:[#allocation2] sm:$0xff]  ;;  %v45_v2 = vld [vmem:[#allocation2 + $0x8] sm:$0xff]  ;;  %s179_s0 = smov [#allocation7]   ;;  %s78_s23 = sshll.u32 %s215_s2, 4  ;;  %s79_s23 = int_to_ptr.hbm [resolvable:$true] %s78_s23 }
   0xd   :  { %v52_v1 = vld [vmem:[#allocation5] sm:$0xff]  ;;  %v53_v4 = vld [vmem:[#allocation5 + $0x8] sm:$0xff]  ;;  %v46_v5 = vld [vmem:[#allocation2 + $0x10] sm:$0xff]  ;;  %s76_s1 = sshll.u32 %s179_s0, 4  ;;  %s77_s1 = int_to_ptr.vmem [resolvable:$true] %s76_s1 }
   0xe   :  { %v56_v3 = vadd.f32 %v52_v1, %v44_v0  ;;  %v54_v6 = vld [vmem:[#allocation5 + $0x10] sm:$0xff]  ;;  %v57_v7 = vadd.f32 %v53_v4, %v45_v2  ;;  %v47_v9 = vld [vmem:[#allocation2 + $0x18] sm:$0xff]  ;;  %v48_v11 = vld [vmem:[#allocation2 + $0x20] sm:$0xff] }
   0xf   :  { %v58_v8 = vadd.f32 %v54_v6, %v46_v5  ;;  %v55_v10 = vld [vmem:[#allocation5 + $0x18] sm:$0xff]  ;;  %v60_v13 = vadd.f32 %v52_v1, %v48_v11  ;;  %v49_v14 = vld [vmem:[#allocation2 + $0x28] sm:$0xff]  ;;  %v50_v15 = vld [vmem:[#allocation2 + $0x30] sm:$0xff] }
  0x10   :  { %64 = vst [vmem:[#allocation7] sm:$0xff] %v56_v3  ;;  %v59_v12 = vadd.f32 %v55_v10, %v47_v9  ;;  %v51_v16 = vld [vmem:[#allocation2 + $0x38] sm:$0xff]  ;;  %v61_v17 = vadd.f32 %v53_v4, %v49_v14  ;;  %v62_v18 = vadd.f32 %v54_v6, %v50_v15 }
  0x11   :  { %65 = vst [vmem:[#allocation7 + $0x8] sm:$0xff] %v57_v7  ;;  %v63_v19 = vadd.f32 %v55_v10, %v51_v16 }
  0x12   :  { %66 = vst [vmem:[#allocation7 + $0x10] sm:$0xff] %v58_v8 }
  0x13   :  { %67 = vst [vmem:[#allocation7 + $0x18] sm:$0xff] %v59_v12 }
  0x14   :  { %68 = vst [vmem:[#allocation7 + $0x20] sm:$0xff] %v60_v13 }
  0x15   :  { %69 = vst [vmem:[#allocation7 + $0x28] sm:$0xff] %v61_v17 }
  0x16   :  { %70 = vst [vmem:[#allocation7 + $0x30] sm:$0xff] %v62_v18 }
  0x17   :  { %71 = vst [vmem:[#allocation7 + $0x38] sm:$0xff] %v63_v19 }
  0x18   :  { %84 = dma.vmem_to_hbm [thread:$0]  %s77_s1, 1024, %s79_s23, [#allocation4], %s176_s17, %s176_s17, %s177_s18  }
  0x19   :  { %173 = dma.done.wait [#allocation4], 1024  }
  0x1a   :  { %174 = vsyncadd [#allocation4], 4294966272 }
  0x1b   :  { %89 = vsyncpa [#allocation3], 1 }
  0x1c   :  { %90 = vsyncpa [#allocation6], 1 }
  0x1d   :  { %91 = vsyncpa [#allocation4], 1 }

</bundles_post_ra>
